<compile_context>
chip_gen: v6e
topology: v6e:2x2x1
jax: 0.10.0
libtpu: 0.0.40
codegen_flags: <defaults>
</compile_context>

<pallas_src>
import jax
import jax.numpy as jnp
from jax.experimental import pallas as pl
from jax.experimental.pallas import tpu as pltpu


# ------------------------------------ kernel ------------------------------------

def residual_block_kernel(x_ref, w1_ref, b1_ref, w2_ref, b2_ref, o_ref):
  x = x_ref[...]                                                     # (TB, H) f32
  # linear1 + ReLU  (one MXU-shaped matmul for the whole batch tile)
  h = jnp.dot(x, w1_ref[...], preferred_element_type=jnp.float32) + b1_ref[...]
  h = jnp.maximum(h, 0.0)
  # nn.Dropout(p=0.5) is identity in eval mode.
  # TODO(synk): train-mode dropout (stochastic masking) not implemented here.
  # linear2 + ReLU
  y = jnp.dot(h, w2_ref[...], preferred_element_type=jnp.float32) + b2_ref[...]
  y = jnp.maximum(y, 0.0)
  # residual add
  o_ref[...] = (x + y).astype(o_ref.dtype)


# ------------------------------- params + wrapper -------------------------------

def init_residual_block_params(key, hidden_size):
  # torch nn.Linear default init: U(-1/sqrt(fan_in), 1/sqrt(fan_in)).
  k1, k2, k3, k4 = jax.random.split(key, 4)
  bound = 1.0 / (hidden_size ** 0.5)

  def u(k, shape):
    return jax.random.uniform(k, shape, jnp.float32, -bound, bound)

  return {
      "w1": u(k1, (hidden_size, hidden_size)),   # pre-transposed (fan_in, fan_out)
      "b1": u(k2, (1, hidden_size)),
      "w2": u(k3, (hidden_size, hidden_size)),
      "b2": u(k4, (1, hidden_size)),
  }


def residual_block_apply(params, x, *, block_b=32):
  B, H = x.shape
  TB = min(block_b, B)
  # Pad the batch to a multiple of the tile so every grid step is full; the
  # padded rows are cheap (pure compute on zeros) and sliced off afterwards.
  B_pad = pl.cdiv(B, TB) * TB
  xp = x.astype(jnp.float32)
  if B_pad != B:
    xp = jnp.pad(xp, ((0, B_pad - B), (0, 0)))

  w_spec = pl.BlockSpec((H, H), lambda i: (0, 0))   # weights stay VMEM-resident
  b_spec = pl.BlockSpec((1, H), lambda i: (0, 0))

  out = pl.pallas_call(
      residual_block_kernel,
      out_shape=jax.ShapeDtypeStruct((B_pad, H), jnp.float32),
      grid=(B_pad // TB,),
      in_specs=[
          pl.BlockSpec((TB, H), lambda i: (i, 0)),  # x, batch-tiled & pipelined
          w_spec, b_spec, w_spec, b_spec,
      ],
      out_specs=pl.BlockSpec((TB, H), lambda i: (i, 0)),
      compiler_params=pltpu.CompilerParams(
          dimension_semantics=("parallel",),
          vmem_limit_bytes=32 * 1024 * 1024,
      ),
  )(xp, params["w1"], params["b1"], params["w2"], params["b2"])

  return out[:B]


def residual_block_reference(params, x):
  h = jnp.maximum(
      jnp.dot(x, params["w1"], preferred_element_type=jnp.float32,
              precision=jax.lax.Precision.HIGHEST) + params["b1"], 0.0)
  y = jnp.maximum(
      jnp.dot(h, params["w2"], preferred_element_type=jnp.float32,
              precision=jax.lax.Precision.HIGHEST) + params["b2"], 0.0)
  return x + y


# ------------------------------------- main -------------------------------------

if __name__ == "__main__":
  B, H = 64, 128   # small batch, hidden_size=128 (lane-dense)

  root = jax.random.PRNGKey(0)
  k_params, k_x = jax.random.split(root)

  params = init_residual_block_params(k_params, H)
  x = jax.random.normal(k_x, (B, H), dtype=jnp.float32)

  out = residual_block_apply(params, x, block_b=32)
  out = jax.block_until_ready(out)

  assert out.shape == (B, H)
  assert bool(jnp.all(jnp.isfinite(out)))

  ref = residual_block_reference(params, x)
  assert bool(jnp.allclose(out, ref, rtol=2e-2, atol=2e-2)), (
      "max abs err = %f" % float(jnp.max(jnp.abs(out - ref))))

  print("KERNEL_OK")
</pallas_src>

<mosaic_0001>
module attributes {stable_mosaic.version = 11 : i64} {
  func.func @residual_block_kernel(%arg0: i32, %arg1: memref<32x128xf32, #tpu.memory_space<vmem>>, %arg2: memref<128x128xf32, #tpu.memory_space<vmem>>, %arg3: memref<1x128xf32, #tpu.memory_space<vmem>>, %arg4: memref<128x128xf32, #tpu.memory_space<vmem>>, %arg5: memref<1x128xf32, #tpu.memory_space<vmem>>, %arg6: memref<32x128xf32, #tpu.memory_space<vmem>>) attributes {dimension_semantics = [#tpu.dimension_semantics<parallel>], iteration_bounds = array<i64: 2>, scalar_prefetch = 0 : i64, scratch_operands = 0 : i64, tpu.core_type = #tpu.core_type<tc>, window_params = [{transform_indices = @transform_0, window_bounds = array<i64: 32, 128>}, {pipeline_mode = #tpu.pipeline_mode<synchronous>, transform_indices = @transform_1, window_bounds = array<i64: 128, 128>}, {pipeline_mode = #tpu.pipeline_mode<synchronous>, transform_indices = @transform_2, window_bounds = array<i64: 1, 128>}, {pipeline_mode = #tpu.pipeline_mode<synchronous>, transform_indices = @transform_3, window_bounds = array<i64: 128, 128>}, {pipeline_mode = #tpu.pipeline_mode<synchronous>, transform_indices = @transform_4, window_bounds = array<i64: 1, 128>}, {transform_indices = @transform_5, window_bounds = array<i64: 32, 128>}]} {
    %c0 = arith.constant 0 : index
    %c0_0 = arith.constant 0 : index
    %0 = vector.load %arg1[%c0, %c0_0] : memref<32x128xf32, #tpu.memory_space<vmem>>, vector<32x128xf32>
    %c0_1 = arith.constant 0 : index
    %c0_2 = arith.constant 0 : index
    %1 = vector.load %arg2[%c0_1, %c0_2] : memref<128x128xf32, #tpu.memory_space<vmem>>, vector<128x128xf32>
    %cst = arith.constant dense<0.000000e+00> : vector<32x128xf32>
    %2 = tpu.matmul %0, %1, %cst {dimension_numbers = #tpu.dot_dimension_numbers<[1], [0], [0], [1], [0, 0, 1, 1], [], []>} : vector<32x128xf32>, vector<128x128xf32>, vector<32x128xf32> -> vector<32x128xf32>
    %c0_3 = arith.constant 0 : index
    %c0_4 = arith.constant 0 : index
    %3 = vector.load %arg3[%c0_3, %c0_4] : memref<1x128xf32, #tpu.memory_space<vmem>>, vector<1x128xf32>
    %4 = vector.broadcast %3 : vector<1x128xf32> to vector<32x128xf32>
    %5 = arith.addf %2, %4 : vector<32x128xf32>
    %cst_5 = arith.constant 0.000000e+00 : f32
    %6 = vector.broadcast %cst_5 : f32 to vector<32x128xf32>
    %7 = arith.maximumf %5, %6 : vector<32x128xf32>
    %c0_6 = arith.constant 0 : index
    %c0_7 = arith.constant 0 : index
    %8 = vector.load %arg4[%c0_6, %c0_7] : memref<128x128xf32, #tpu.memory_space<vmem>>, vector<128x128xf32>
    %cst_8 = arith.constant dense<0.000000e+00> : vector<32x128xf32>
    %9 = tpu.matmul %7, %8, %cst_8 {dimension_numbers = #tpu.dot_dimension_numbers<[1], [0], [0], [1], [0, 0, 1, 1], [], []>} : vector<32x128xf32>, vector<128x128xf32>, vector<32x128xf32> -> vector<32x128xf32>
    %c0_9 = arith.constant 0 : index
    %c0_10 = arith.constant 0 : index
    %10 = vector.load %arg5[%c0_9, %c0_10] : memref<1x128xf32, #tpu.memory_space<vmem>>, vector<1x128xf32>
    %11 = vector.broadcast %10 : vector<1x128xf32> to vector<32x128xf32>
    %12 = arith.addf %9, %11 : vector<32x128xf32>
    %cst_11 = arith.constant 0.000000e+00 : f32
    %13 = vector.broadcast %cst_11 : f32 to vector<32x128xf32>
    %14 = arith.maximumf %12, %13 : vector<32x128xf32>
    %15 = arith.addf %0, %14 : vector<32x128xf32>
    %c0_12 = arith.constant 0 : index
    %c0_13 = arith.constant 0 : index
    %16 = vector.load %arg6[%c0_12, %c0_13] : memref<32x128xf32, #tpu.memory_space<vmem>>, vector<32x128xf32>
    tpu.vector_store %arg6[%c0_12, %c0_13], %15 {strides = array<i32>} : memref<32x128xf32, #tpu.memory_space<vmem>>, vector<32x128xf32>,
    return
  }
  func.func @transform_0(%arg0: i32) -> (i32, i32) {
    %c0_i32 = arith.constant 0 : i32
    %c0_i32_0 = arith.constant 0 : i32
    return %arg0, %c0_i32 : i32, i32
  }
  func.func @transform_1(%arg0: i32) -> (i32, i32) {
    %c0_i32 = arith.constant 0 : i32
    %c0_i32_0 = arith.constant 0 : i32
    %c0_i32_1 = arith.constant 0 : i32
    return %c0_i32, %c0_i32_0 : i32, i32
  }
  func.func @transform_2(%arg0: i32) -> (i32, i32) {
    %c0_i32 = arith.constant 0 : i32
    %c0_i32_0 = arith.constant 0 : i32
    %c0_i32_1 = arith.constant 0 : i32
    return %c0_i32, %c0_i32_0 : i32, i32
  }
  func.func @transform_3(%arg0: i32) -> (i32, i32) {
    %c0_i32 = arith.constant 0 : i32
    %c0_i32_0 = arith.constant 0 : i32
    %c0_i32_1 = arith.constant 0 : i32
    return %c0_i32, %c0_i32_0 : i32, i32
  }
  func.func @transform_4(%arg0: i32) -> (i32, i32) {
    %c0_i32 = arith.constant 0 : i32
    %c0_i32_0 = arith.constant 0 : i32
    %c0_i32_1 = arith.constant 0 : i32
    return %c0_i32, %c0_i32_0 : i32, i32
  }
  func.func @transform_5(%arg0: i32) -> (i32, i32) {
    %c0_i32 = arith.constant 0 : i32
    %c0_i32_0 = arith.constant 0 : i32
    return %arg0, %c0_i32 : i32, i32
  }
}

</mosaic_0001>

<bundles_post_ra>
// kernel: tpu_custom_call.1
= control target key start
LH: loop header
LB: loop body
LE: loop exit
PB: predicated region body
PF: predicated region fallthrough
CT: control target
= control target key end

     0   :  { %10 = vsyncpa [#allocation3], 0  ;;  %s1230_s0 = inlined_call_operand.hbm [shape: f32[64,128], index: 0, kind: input, shape index: {}]   ;;  %s1231_s1 = inlined_call_operand.hbm [shape: f32[128,128], index: 1, kind: input, shape index: {}]   ;;  %s1232_s2 = inlined_call_operand.vmem [shape: f32[1,128], index: 2, kind: input, shape index: {}]   ;;  %s1233_s3 = inlined_call_operand.hbm [shape: f32[128,128], index: 3, kind: input, shape index: {}]   ;;  %s1234_s4 = inlined_call_operand.vmem [shape: f32[1,128], index: 4, kind: input, shape index: {}]   ;;  %s1235_s5 = inlined_call_operand.hbm [shape: f32[64,128], index: 5, kind: output, shape index: {}]  }
   0x1   :  { %12 = vsyncpa [#allocation3 + $0x1], 0 }
   0x2   :  { %13 = vsyncpa [#allocation6], 0 }
   0x3   :  { %14 = vsyncpa [#allocation4], 0 }
   0x4   :  { %16 = vsyncpa [#allocation4 + $0x1], 0  ;;  %s1013_s18 = smov 0   ;;  %s1015_s19 = smov 0  }
   0x5   :  { %s1017_s20 = smov 0   ;;  %s1019_s21 = smov 0  }
   0x6 LB: > { %s1034_s22 = sadd.s32 4294967295, %s973_s21   ;;  %s616_s23 = sadd.s32 4294967294, %s973_s21   ;;  %s973_s21 = sphi %s1019_s21, %s1258_s21   ;;  %s969_s20 = sphi %s1017_s20, %s1257_s20   ;;  %s965_s19 = sphi %s1015_s19, %s1256_s19   ;;  %s961_s18 = sphi %s1013_s18, %s1255_s18  }
   0x7   : > { %p42_p0 = scmp.ne.s32.totalorder %s965_s19, %s961_s18  ;;  %p1236_p1 = scmp.eq.s32.totalorder %s1034_s22, 0 }
   0x8   : > { %p150_p2 = scmp.eq.s32.totalorder %s1034_s22, 1  ;;  %p156_p3 = scmp.eq.s32.totalorder %s616_s23, 1 }
   0x9   : > { %p1043_p4 = por %p1236_p1, %p42_p0  ;;  %p617_p5 = scmp.ge.s32.totalorder %s973_s21, 1 }
   0xa   : > { %p1048_p6 = por %p156_p3, %p42_p0  ;;  %p163_p7 = scmp.lt.s32.totalorder %s973_s21, 3 }
   0xb   : > { %s1241_s24 = scalar_select %p1043_p4, 1, 0 }
   0xc   : > { %s1242_s25 = scalar_select %p1048_p6, 1, 0 }
   0xd   : > { %p1053_p8 = pnand %p617_p5, %p163_p7  ;;  %s975_s27 = smov [#allocation5]  }
   0xe   : > { %s175_s28 = sshll.u32 %s975_s27, 4  ;;  %s976_s30 = smov [#allocation7]   ;;  %s176_s28 = int_to_ptr.vmem [resolvable:$true] %s175_s28 }
   0xf   : > { %s1243_s26 = scalar_select %p1053_p8, 1, 0 }
  0x10   : > { %p766_p9 = pneg %p1053_p8  ;;  %s191_s6 = sshll.u32 %s976_s30, 4  ;;  %s192_s6 = int_to_ptr.vmem [resolvable:$true] %s191_s6 }
  0x11   : > { %s836_s7 = scalar_lea.vmem %s176_s28, 2048  ;;  %p844_p5 = scmp.lt.s32.totalorder %s176_s28, %s176_s28 }
  0x12   : > { %p1062_p11 = pnand %p766_p9, %p1236_p1  ;;  %p837_p13 = scmp.ne.s32.totalorder %s176_s28, %s836_s7 }
  0x13   : > { %p845_p7 = scmp.lt.s32.totalorder %s836_s7, %s836_s7 }
  0x14   : > { %p827_p12 = pneg %p1062_p11 }
  0x15   : > { %p846_p10 = por %p845_p7, %p844_p5 }
  0x16   : > { %p839_p0 = pnand %p837_p13, %p827_p12 }
  0x18   : > { %p840_p3 = pneg %p839_p0 }
  0x1a   : > { %p847_p9 = pnand %p846_p10, %p840_p3 }
  0x1c   : > { %850 = shalt.err (!%p847_p9)
}
  0x1d   : > { %s1237_s8 = smov 128   ;;  %s978_s9 = smov 8  }
  0x1e   : > { %769 = dma.hbm_to_vmem [thread:$0]  (!%p1062_p11), %s1231_s1, 2048, %s176_s28, [#allocation6], %s1237_s8, %s1237_s8, %s978_s9  }
  0x1f   : > { %s862_s12 = scalar_lea.vmem %s192_s6, 2048  ;;  %p870_p10 = scmp.lt.s32.totalorder %s192_s6, %s192_s6 }
  0x20   : > { %p863_p13 = scmp.ne.s32.totalorder %s192_s6, %s862_s12  ;;  %p871_p3 = scmp.lt.s32.totalorder %s862_s12, %s862_s12 }
  0x22   : > { %p865_p0 = pnand %p863_p13, %p827_p12  ;;  %p872_p7 = por %p871_p3, %p870_p10 }
  0x24   : > { %p866_p5 = pneg %p865_p0 }
  0x26   : > { %p873_p9 = pnand %p872_p7, %p866_p5 }
  0x28   : > { %876 = shalt.err (!%p873_p9)
}
  0x29   : > { %772 = dma.hbm_to_vmem [thread:$0]  (!%p1062_p11), %s1233_s3, 2048, %s192_s6, [#allocation6], %s1237_s8, %s1237_s8, %s978_s9  }
  0x2a   : > { %s1091_s15 = sadd.s32 1, %s973_s21   ;;  %s29_s16 = sadd.s32 1, %s969_s20 }
  0x2b   : > { %s26_s17 = ssub.s32 %s973_s21, %s1091_s15  ;;  %p36_p12 = scmp.ne.s32.totalorder %s969_s20, %s965_s19 }
  0x2c   : > { %p27_p13 = scmp.eq.s32.totalorder %s26_s17, 0  ;;  %p37_p0 = scmp.eq.s32.totalorder %s973_s21, 0 }
  0x2d   : > { %p1101_p5 = por %p150_p2, %p36_p12  ;;  %p783_p10 = scmp.lt.s32.totalorder %s973_s21, 2 }
  0x2e   : > { %s1107_s27 = scalar_select %p27_p13, %s969_s20, %s29_s16  }
  0x2f   : > { %s1245_s23 = scalar_select %p1101_p5, 1, 0 }
  0x30   : > { %p38_p3 = por %p37_p0, %p36_p12  ;;  %s208_s28 = sand.u32 1, %s969_s20  }
  0x31   : > { %s621_s29 = sshll.u32 %s208_s28, 5  ;;  %s636_s30 = sshll.u32 %s973_s21, 9 }
  0x32   : > { %s1114_s10 = scalar_lea.hbm %s1230_s0, %s636_s30  ;;  %s212_s11 = scalar_lea.vmem [#allocation2], %s621_s29 }
  0x33   : > { %s219_s12 = sshll.u32 %s212_s11, 4  ;;  %p1118_p2 = pnand %p783_p10, %p38_p3  ;;  %s1116_s12 = int_to_ptr.vmem [resolvable:$true] %s219_s12 }
  0x34   : > { %s1122_s14 = scalar_lea.sflag [#allocation3], %s208_s28  ;;  %s877_s16 = scalar_lea.hbm %s1114_s10, 512 }
  0x35   : > { %p878_p11 = scmp.ne.s32.totalorder %s1114_s10, %s877_s16  ;;  %p879_p7 = pneg %p1118_p2 }
  0x36   : > { %s882_s29 = scalar_lea.hbm %s1230_s0, 1024  ;;  %p883_p13 = scmp.lt.s32.totalorder %s1114_s10, %s1230_s0 }
  0x37   : > { %p880_p9 = pnand %p879_p7, %p878_p11  ;;  %p884_p0 = scmp.lt.s32.totalorder %s882_s29, %s877_s16 }
  0x39   : > { %p881_p12 = pneg %p880_p9  ;;  %p885_p10 = por %p884_p0, %p883_p13 }
  0x3b   : > { %p886_p3 = pnand %p885_p10, %p881_p12 }
  0x3d   : > { %889 = shalt.err (!%p886_p3)
}
  0x3e   : > { %s890_s28 = scalar_lea.vmem %s1116_s12, 512  ;;  %s979_s11 = smov [#allocation2]  }
  0x3f   : > { %p891_p1 = scmp.ne.s32.totalorder %s1116_s12, %s890_s28  ;;  %s895_s8 = sshll.u32 %s979_s11, 4  ;;  %s896_s8 = int_to_ptr.vmem [resolvable:$false] %s895_s8 }
  0x40   : > { %s897_s17 = scalar_lea.vmem %s896_s8, 1024  ;;  %p898_p9 = scmp.lt.s32.totalorder %s1116_s12, %s896_s8 }
  0x41   : > { %p893_p6 = pnand %p891_p1, %p879_p7  ;;  %p899_p5 = scmp.lt.s32.totalorder %s897_s17, %s890_s28 }
  0x43   : > { %p894_p11 = pneg %p893_p6  ;;  %p900_p4 = por %p899_p5, %p898_p9 }
  0x45   : > { %p901_p8 = pnand %p900_p4, %p894_p11 }
  0x47   : > { %904 = shalt.err (!%p901_p8)
}
  0x48   : > { %s1247_s16 = smov 128   ;;  %p1248_p1 = scmp.ne.s32.totalorder %s1243_s26, 0 }
  0x49   : > { %776 = dma.hbm_to_vmem [thread:$0]  (!%p1118_p2), %s1114_s10, 512, %s1116_s12, %s1122_s14, %s1247_s16, %s1247_s16, %s978_s9  }
  0x4a   : > { %231 = sbr.rel (%p1248_p1) target bundleno = 535 (0x217), region = 40  ;;  %s1149_s30 = sand.u32 (!%p1248_p1), 1, %s965_s19  }
  0x4b   : > { %s625_s8 = sshll.u32 (!%p1248_p1), %s1149_s30, 5  ;;  %s234_s29 = scalar_lea.sflag (!%p1248_p1), [#allocation3], %s1149_s30 }
  0x4c   : > { %s1155_s13 = scalar_lea.vmem (!%p1248_p1), [#allocation2], %s625_s8  ;;  %p1249_p4 = scmp.ne.s32.totalorder (!%p1248_p1), %s1241_s24, 0 }
  0x4f   : > { %948 = dma.done.wait (%p1249_p4), %s234_s29, 512  }
  0x50   : > { %950 = vsyncadd (%p1249_p4), %s234_s29, 4294966784  ;;  %p1250_p6 = scmp.eq.s32.totalorder %s1034_s22, 0 }
  0x52   : > { %952 = dma.done.wait (%p1250_p6), [#allocation6], 4096   ;;  %p1251_p8 = pmov %p1250_p6 }
  0x53   : > { %v293_v0 = vld [vmem:[#allocation5 + $0x78] sm:$0xff]  ;;  %v292_v1 = vld [vmem:[#allocation5 + $0x70] sm:$0xff]  ;;  %v291_v2 = vld [vmem:[#allocation5 + $0x68] sm:$0xff]  ;;  %s271_s12 = scalar_lea.vmem [#allocation8], %s625_s8  ;;  %s637_s6 = sshll.u32 %s1034_s22, 9 }
  0x54   : > { %954 = vsyncadd (%p1251_p8), [#allocation6], 4294963200  ;;  %678 = vmatprep.subr.mxu0 %v293_v0  ;;  %v290_v3 = vld [vmem:[#allocation5 + $0x60] sm:$0xff]  ;;  %v289_v5 = vld [vmem:[#allocation5 + $0x58] sm:$0xff]  ;;  %s524_s14 = sshll.u32 %s271_s12, 4  ;;  %s1187_s11 = scalar_lea.hbm %s1235_s5, %s637_s6  ;;  %s1182_s14 = int_to_ptr.vmem [resolvable:$true] %s524_s14 }
  0x55   : > { %679 = vmatpush3.msra.mxu0 %v293_v0  ;;  %v1166_v4 = vld [vmem:[%s1155_s13] sm:$0xff]  ;;  %v405_v6 = vld [vmem:[#allocation7 + $0x78] sm:$0xff]  ;;  %v404_v7 = vld [vmem:[#allocation7 + $0x70] sm:$0xff]  ;;  %s511_s17 = scalar_lea.sflag [#allocation4], %s1149_s30  ;;  %s905_s16 = scalar_lea.vmem %s1182_s14, 512 }
  0x56   : > { %680 = vmatprep.subr.mxu0 %v292_v1  ;;  %710 = vmatprep.mubr.f32.mxu0 %v1166_v4  ;;  %v288_v8 = vld [vmem:[#allocation5 + $0x50] sm:$0xff]  ;;  %v403_v9 = vld [vmem:[#allocation7 + $0x68] sm:$0xff]  ;;  %v402_v11 = vld [vmem:[#allocation7 + $0x60] sm:$0xff]  ;;  %p906_p5 = scmp.ne.s32.totalorder %s1182_s14, %s905_s16  ;;  %p1252_p2 = scmp.ne.s32.totalorder %s1245_s23, 0 }
  0x57   : > { %681 = vmatpush3.msra.mxu0 %v292_v1  ;;  %716 = vmatprep.subr.mxu1 %v405_v6  ;;  %v287_v10 = vld [vmem:[#allocation5 + $0x48] sm:$0xff]  ;;  %v286_v12 = vld [vmem:[#allocation5 + $0x40] sm:$0xff]  ;;  %v401_v13 = vld [vmem:[#allocation7 + $0x58] sm:$0xff]  ;;  %s980_s22 = smov [#allocation8]  }
  0x58   : > { %682 = vmatprep.subr.mxu0 %v291_v2  ;;  %717 = vmatpush3.msra.mxu1 %v405_v6  ;;  %v285_v14 = vld [vmem:[#allocation5 + $0x38] sm:$0xff]  ;;  %v400_v15 = vld [vmem:[#allocation7 + $0x50] sm:$0xff]  ;;  %v399_v17 = vld [vmem:[#allocation7 + $0x48] sm:$0xff]  ;;  %p907_p7 = pnand %p906_p5, %p1252_p2  ;;  %s909_s8 = sshll.u32 %s980_s22, 4  ;;  %s910_s8 = int_to_ptr.vmem [resolvable:$false] %s909_s8 }
  0x59   : > { %683 = vmatpush3.msra.mxu0 %v291_v2  ;;  %718 = vmatprep.subr.mxu1 %v404_v7  ;;  %v284_v16 = vld [vmem:[#allocation5 + $0x30] sm:$0xff]  ;;  %v283_v18 = vld [vmem:[#allocation5 + $0x28] sm:$0xff]  ;;  %v398_v19 = vld [vmem:[#allocation7 + $0x40] sm:$0xff]  ;;  %s911_s29 = scalar_lea.vmem %s910_s8, 1024  ;;  %p912_p13 = scmp.lt.s32.totalorder %s1182_s14, %s910_s8 }
  0x5a   : > { %684 = vmatprep.subr.mxu0 %v290_v3  ;;  %719 = vmatpush3.msra.mxu1 %v404_v7  ;;  %v282_v20 = vld [vmem:[#allocation5 + $0x20] sm:$0xff]  ;;  %v397_v21 = vld [vmem:[#allocation7 + $0x38] sm:$0xff]  ;;  %v396_v23 = vld [vmem:[#allocation7 + $0x30] sm:$0xff]  ;;  %p908_p12 = pneg %p907_p7  ;;  %p913_p0 = scmp.lt.s32.totalorder %s911_s29, %s905_s16 }
  0x5b   : > { %685 = vmatpush3.msra.mxu0 %v290_v3  ;;  %720 = vmatprep.subr.mxu1 %v403_v9  ;;  %v281_v22 = vld [vmem:[#allocation5 + $0x18] sm:$0xff]  ;;  %v280_v24 = vld [vmem:[#allocation5 + $0x10] sm:$0xff]  ;;  %v395_v25 = vld [vmem:[#allocation7 + $0x28] sm:$0xff] }
  0x5c   : > { %686 = vmatprep.subr.mxu0 %v289_v5  ;;  %721 = vmatpush3.msra.mxu1 %v403_v9  ;;  %v279_v26 = vld [vmem:[#allocation5 + $0x8] sm:$0xff]  ;;  %v394_v27 = vld [vmem:[#allocation7 + $0x20] sm:$0xff]  ;;  %v276_v30 = vld [vmem:[%s1155_s13 + $0x10] sm:$0xff]  ;;  %p914_p10 = por %p913_p0, %p912_p13 }
  0x5d   : > { %687 = vmatpush3.msra.mxu0 %v289_v5  ;;  %722 = vmatprep.subr.mxu1 %v402_v11  ;;  %v278_v28 = vld [vmem:[#allocation5] sm:$0xff]  ;;  %v275_v29 = vld [vmem:[%s1155_s13 + $0x8] sm:$0xff]  ;;  %v277_v31 = vld [vmem:[%s1155_s13 + $0x18] sm:$0xff] }
  0x5e   : > { %688 = vmatprep.subr.mxu0 %v288_v8  ;;  %723 = vmatpush3.msra.mxu1 %v402_v11  ;;  %v393_v32 = vld [vmem:[#allocation7 + $0x18] sm:$0xff]  ;;  %v392_v33 = vld [vmem:[#allocation7 + $0x10] sm:$0xff]  ;;  %v391_v34 = vld [vmem:[#allocation7 + $0x8] sm:$0xff]  ;;  %p915_p3 = pnand %p914_p10, %p908_p12 }
  0x5f   : > { %689 = vmatpush3.msra.mxu0 %v288_v8  ;;  %724 = vmatprep.subr.mxu1 %v401_v13  ;;  %v390_v35 = vld [vmem:[#allocation7] sm:$0xff] }
  0x60   : > { %690 = vmatprep.subr.mxu0 %v287_v10  ;;  %725 = vmatpush3.msra.mxu1 %v401_v13  ;;  %v629_v36 = vld [vmem:[%s1232_s2] ss:$0 sm:$0xff] }
  0x61   : > { %691 = vmatpush3.msra.mxu0 %v287_v10  ;;  %726 = vmatprep.subr.mxu1 %v400_v15  ;;  %v630_v49 = vld [vmem:[%s1234_s4] ss:$0 sm:$0xff] }
  0x62   : > { %692 = vmatprep.subr.mxu0 %v286_v12  ;;  %727 = vmatpush3.msra.mxu1 %v400_v15 }
  0x63   : > { %693 = vmatpush3.msra.mxu0 %v286_v12  ;;  %728 = vmatprep.subr.mxu1 %v399_v17 }
  0x64   : > { %694 = vmatprep.subr.mxu0 %v285_v14  ;;  %729 = vmatpush3.msra.mxu1 %v399_v17 }
  0x65   : > { %695 = vmatpush3.msra.mxu0 %v285_v14  ;;  %730 = vmatprep.subr.mxu1 %v398_v19 }
  0x66   : > { %696 = vmatprep.subr.mxu0 %v284_v16  ;;  %731 = vmatpush3.msra.mxu1 %v398_v19 }
  0x67   : > { %697 = vmatpush3.msra.mxu0 %v284_v16  ;;  %732 = vmatprep.subr.mxu1 %v397_v21 }
  0x68   : > { %698 = vmatprep.subr.mxu0 %v283_v18  ;;  %733 = vmatpush3.msra.mxu1 %v397_v21 }
  0x69   : > { %699 = vmatpush3.msra.mxu0 %v283_v18  ;;  %734 = vmatprep.subr.mxu1 %v396_v23 }
  0x6a   : > { %700 = vmatprep.subr.mxu0 %v282_v20  ;;  %735 = vmatpush3.msra.mxu1 %v396_v23 }
  0x6b   : > { %701 = vmatpush3.msra.mxu0 %v282_v20  ;;  %736 = vmatprep.subr.mxu1 %v395_v25 }
  0x6c   : > { %702 = vmatprep.subr.mxu0 %v281_v22  ;;  %737 = vmatpush3.msra.mxu1 %v395_v25 }
  0x6d   : > { %703 = vmatpush3.msra.mxu0 %v281_v22  ;;  %738 = vmatprep.subr.mxu1 %v394_v27 }
  0x6e   : > { %704 = vmatprep.subr.mxu0 %v280_v24  ;;  %739 = vmatpush3.msra.mxu1 %v394_v27 }
  0x6f   : > { %705 = vmatpush3.msra.mxu0 %v280_v24  ;;  %740 = vmatprep.subr.mxu1 %v393_v32 }
  0x70   : > { %706 = vmatprep.subr.mxu0 %v279_v26  ;;  %741 = vmatpush3.msra.mxu1 %v393_v32 }
  0x71   : > { %707 = vmatpush3.msra.mxu0 %v279_v26  ;;  %742 = vmatprep.subr.mxu1 %v392_v33 }
  0x72   : > { %708 = vmatprep.subr.mxu0 %v278_v28  ;;  %743 = vmatpush3.msra.mxu1 %v392_v33 }
  0x73   : > { %709 = vmatpush3.msra.mxu0 %v278_v28  ;;  %744 = vmatprep.subr.mxu1 %v391_v34 }
  0x74   : > { %711 = vmatmul.mubr.f32.vlgmr.msra.gmra.mxu0 %v275_v29  ;;  %745 = vmatpush3.msra.mxu1 %v391_v34 }
  0x75   : > { %713 = vmatprep.mubr.f32.mxu0 %v276_v30  ;;  %746 = vmatprep.subr.mxu1 %v390_v35 }
  0x76   : > { %747 = vmatpush3.msra.mxu1 %v390_v35 }
  0x78   : > { %714 = vmatmul.mubr.f32.gmra.mxu0 %v277_v31 }
 0x134   : > { %v712_v37 = vpop.f32.mrf.mxu0 }
 0x135   : > { %v373_v38 = vadd.f32 %v712_v37, %v629_v36 }
 0x136   : > { %v367_v39 = vpop.f32.mrf.mxu0 }
 0x137   : > { %v368_v40 = vadd.f32 %v629_v36, %v367_v39  ;;  %v387_v43 = vmax.f32 %v373_v38, 0.0 }
 0x138   : > { %v715_v41 = vpop.f32.mrf.mxu0 }
 0x139   : > { %v386_v42 = vmax.f32 %v368_v40, 0.0  ;;  %v383_v44 = vadd.f32 %v715_v41, %v629_v36 }
 0x13a   : > { %v377_v45 = vpop.f32.mrf.mxu0 }
 0x13b   : > { %v378_v46 = vadd.f32 %v629_v36, %v377_v45  ;;  %748 = vmatprep.mubr.f32.mxu1 %v386_v42  ;;  %v389_v48 = vmax.f32 %v383_v44, 0.0 }
 0x13c   : > { %749 = vmatmul.mubr.f32.vlgmr.msra.gmra.mxu1 %v387_v43 }
 0x13d   : > { %v388_v47 = vmax.f32 %v378_v46, 0.0 }
 0x13f   : > { %751 = vmatprep.mubr.f32.mxu1 %v388_v47 }
 0x140   : > { %752 = vmatmul.mubr.f32.gmra.mxu1 %v389_v48 }
 0x1fc   : > { %v750_v50 = vpop.f32.mrf.mxu1 }
 0x1fd   : > { %v485_v51 = vadd.f32 %v750_v50, %v630_v49 }
 0x1fe   : > { %v479_v52 = vpop.f32.mrf.mxu1 }
 0x1ff   : > { %v499_v53 = vmax.f32 %v485_v51, 0.0  ;;  %v480_v54 = vadd.f32 %v630_v49, %v479_v52 }
 0x200   : > { %v753_v55 = vpop.f32.mrf.mxu1 }
 0x201   : > { %v503_v56 = vadd.f32 %v499_v53, %v275_v29  ;;  %v498_v57 = vmax.f32 %v480_v54, 0.0  ;;  %v495_v58 = vadd.f32 %v753_v55, %v630_v49 }
 0x202   : > { %v489_v59 = vpop.f32.mrf.mxu1 }
 0x203   : > { %507 = vst [vmem:[%s271_s12 + $0x8] sm:$0xff] %v503_v56  ;;  %v502_v60 = vadd.f32 %v498_v57, %v1166_v4  ;;  %v501_v61 = vmax.f32 %v495_v58, 0.0  ;;  %v490_v62 = vadd.f32 %v630_v49, %v489_v59 }
 0x205   : > { %506 = vst [vmem:[%s271_s12] sm:$0xff] %v502_v60  ;;  %v505_v63 = vadd.f32 %v501_v61, %v277_v31  ;;  %v500_v0 = vmax.f32 %v490_v62, 0.0 }
 0x207   : > { %509 = vst [vmem:[%s271_s12 + $0x18] sm:$0xff] %v505_v63  ;;  %v504_v1 = vadd.f32 %v500_v0, %v276_v30 }
 0x209   : > { %508 = vst [vmem:[%s271_s12 + $0x10] sm:$0xff] %v504_v1 }
 0x20a   : > { %918 = shalt.err (!%p915_p3)
}
 0x20b   : > { %s919_s13 = scalar_lea.hbm %s1187_s11, 512  ;;  %s923_s9 = scalar_lea.hbm %s1235_s5, 1024 }
 0x20c   : > { %p920_p11 = scmp.ne.s32.totalorder %s1187_s11, %s919_s13  ;;  %p924_p4 = scmp.lt.s32.totalorder %s1187_s11, %s1235_s5 }
 0x20d   : > { %p925_p6 = scmp.lt.s32.totalorder %s923_s9, %s919_s13 }
 0x20e   : > { %p921_p9 = pnand %p920_p11, %p1252_p2 }
 0x20f   : > { %p926_p8 = por %p925_p6, %p924_p4 }
 0x210   : > { %p922_p1 = pneg %p921_p9 }
 0x212   : > { %p927_p5 = pnand %p926_p8, %p922_p1 }
 0x214   : > { %930 = shalt.err (!%p927_p5)
}
 0x215   : > { %s981_s6 = smov 128   ;;  %s982_s7 = smov 8  }
 0x216   : > { %764 = dma.vmem_to_hbm [thread:$0]  (%p1252_p2), %s1182_s14, 512, %s1187_s11, %s511_s17, %s981_s6, %s981_s6, %s982_s7  }
 0x217 PF: > { %s539_s28 = sand.u32 1, %s961_s18   ;;  %p1253_p7 = scmp.ne.s32.totalorder %s1242_s25, 0 }
 0x218   : > { %p1254_p12 = scmp.ge.s32.totalorder %s973_s21, 2  ;;  %s540_s16 = scalar_lea.sflag [#allocation4], %s539_s28 }
 0x21a   : > { %p778_p13 = pnand %p1254_p12, %p1253_p7 }
 0x21c   : > { %p779_p0 = pneg %p778_p13 }
 0x21e   : > { %956 = dma.done.wait (%p779_p0), %s540_s16, 512  }
 0x21f   : > { %958 = vsyncadd (%p779_p0), %s540_s16, 4294966784  ;;  %p19_p10 = scmp.ge.s32.totalorder %s1091_s15, 4   ;;  %s1255_s18 = smov %s965_s19 }
 0x220   : > { %s1256_s19 = smov %s969_s20  ;;  %s1257_s20 = smov %s1107_s27 }
 0x221   : > { %s1258_s21 = smov %s1091_s15  ;;  %21 = sbr.rel (!%p19_p10) target bundleno = 6 (0x6), region = 93 }
 0x226   :  { %545 = vsyncpa [#allocation3], 1 }
 0x227   :  { %547 = vsyncpa [#allocation3 + $0x1], 1 }
 0x228   :  { %548 = vsyncpa [#allocation6], 1 }
 0x229   :  { %549 = vsyncpa [#allocation4], 1 }
 0x22a   :  { %551 = vsyncpa [#allocation4 + $0x1], 1 }

</bundles_post_ra>
